<compile_context>
chip_gen: v7x
topology: tpu7x:2x2x1
jax: 0.10.0
libtpu: 0.0.40
codegen_flags: <defaults>
</compile_context>

<pallas_src>
import functools

import jax
import jax.numpy as jnp
from jax.experimental import pallas as pl
from jax.experimental.pallas import tpu as pltpu


def _apply_activation(y, activation):
    if activation == "relu":
        return jnp.maximum(y, 0.0)
    if activation == "sigmoid":
        return jax.nn.sigmoid(y)
    if activation in ("linear", "identity", None):
        return y
    # TODO(synk): 'dice' / 'prelu' activations (learned params + BN stats) are not wired up.
    raise NotImplementedError(f"activation '{activation}' not supported in the Pallas kernel")


def _residual_kernel(num_layers, activation, x_ref, w_ref, b_ref, o_ref):
    """One grid step = one tile of batch rows; whole forward unrolled statically.

    x_ref: (BB, D)     raw-input batch tile
    w_ref: (L, D, D)   stacked Linear weights, pre-transposed to (in, out)
    b_ref: (L, 1, D)   stacked biases
    o_ref: (BB, D)     output tile
    """
    raw = x_ref[...].astype(jnp.float32)            # (BB, D) f32 residual anchor
    # Hoist bias casts out of the double loop (no CSE of broadcast/convert in JAX).
    biases_f32 = [b_ref[j].astype(jnp.float32) for j in range(num_layers)]

    x = raw
    for k in range(num_layers):
        y = x
        # self.layers[k] re-applies the shared Linear_0..Linear_k module instances.
        for j in range(k + 1):
            acc = jnp.dot(y.astype(w_ref.dtype), w_ref[j],
                          preferred_element_type=jnp.float32)   # MXU, f32 accum
            acc = acc + biases_f32[j]                           # (1, D) broadcast add
            y = _apply_activation(acc, activation)
            # dropout(rate=0 / eval) == identity
        x = raw + y
    o_ref[...] = x.astype(o_ref.dtype)


def residual_network(inputs, weights, biases, activation="relu"):
    """Pallas equivalent of ResidualNetwork.forward (inference path).

    inputs:  (B, D) activations
    weights: (L, D, D) — weights[j] = torch Linear_j.weight.T (i.e. (in, out) layout)
    biases:  (L, D)
    returns: (B, D)
    """
    B, D = inputs.shape
    L = weights.shape[0]
    assert weights.shape == (L, D, D), "all hidden_units must equal input_dim"
    assert biases.shape == (L, D)

    biases3 = biases.reshape(L, 1, D)

    # --- batch tiling: ~4 MiB of activations per tile, sublane aligned, but
    #     capped so double-buffered tiles + resident params fit a 32 MiB budget.
    itemsize = jnp.dtype(inputs.dtype).itemsize
    param_bytes = (L * D * D + L * D) * jnp.dtype(weights.dtype).itemsize
    budget = (28 << 20) - 2 * param_bytes          # leave headroom under 32 MiB default
    per_row = D * itemsize
    bb = (4 << 20) // max(1, per_row)              # ~4 MiB activation tile target
    bb = min(bb, max(8, budget // max(1, 4 * per_row)))  # 2x double-buffered in+out
    bb = max(8, bb)
    if bb >= B:
        bb = B                                     # block == full array dim: always legal
    else:
        bb = max(8, (bb // 8) * 8)                 # sublane-aligned partial tiles
    grid = (pl.cdiv(B, bb),)

    kernel = functools.partial(_residual_kernel, L, activation)

    # VMEM estimate: double-buffered in/out tiles + resident weights/biases + headroom.
    est_vmem = 2 * 2 * bb * D * max(4, itemsize) + 2 * param_bytes + (2 << 20)
    compiler_kwargs = dict(dimension_semantics=("parallel",))
    if est_vmem > (32 << 20):
        compiler_kwargs["vmem_limit_bytes"] = min(int(est_vmem), 100 << 20)

    out = pl.pallas_call(
        kernel,
        out_shape=jax.ShapeDtypeStruct((B, D), inputs.dtype),
        grid_spec=pltpu.PrefetchScalarGridSpec(
            num_scalar_prefetch=0,
            grid=grid,
            in_specs=[
                pl.BlockSpec((bb, D), lambda i: (i, 0)),        # streamed batch tile
                pl.BlockSpec((L, D, D), lambda i: (0, 0, 0)),   # weights stay VMEM-resident
                pl.BlockSpec((L, 1, D), lambda i: (0, 0, 0)),   # biases stay VMEM-resident
            ],
            out_specs=pl.BlockSpec((bb, D), lambda i: (i, 0)),  # lane/sublane-dense 2-D store
        ),
        compiler_params=pltpu.CompilerParams(**compiler_kwargs),
    )(inputs, weights, biases3)
    return out


def _reference(inputs, weights, biases, activation="relu"):
    """Plain-JAX reference mirroring the PyTorch forward (eval mode, no BN)."""
    raw = inputs.astype(jnp.float32)
    x = raw
    L = weights.shape[0]
    for k in range(L):
        y = x
        for j in range(k + 1):
            y = y @ weights[j].astype(jnp.float32) + biases[j].astype(jnp.float32)
            y = _apply_activation(y, activation)
        x = raw + y
    return x.astype(inputs.dtype)


if __name__ == "__main__":
    key = jax.random.PRNGKey(0)
    B, D, L = 16, 32, 3          # batch, input_dim (= every hidden_units[i]), num Linear layers
    k1, k2, k3 = jax.random.split(key, 3)
    x = jax.random.normal(k1, (B, D), dtype=jnp.float32)
    # torch init: weight ~ N(0, init_std); small random biases stand in for Linear's default init.
    W = 1e-2 * jax.random.normal(k2, (L, D, D), dtype=jnp.float32)
    b = 1e-2 * jax.random.normal(k3, (L, D), dtype=jnp.float32)

    out = residual_network(x, W, b, activation="relu")
    out = jax.block_until_ready(out)
    ref = _reference(x, W, b, activation="relu")

    ok = (out.shape == (B, D)) and bool(jnp.allclose(out, ref, atol=1e-5, rtol=1e-5))
    if ok:
        print("KERNEL_OK")
</pallas_src>

<mosaic_0001>
module attributes {stable_mosaic.version = 11 : i64} {
  func.func @_residual_kernel(%arg0: i32, %arg1: memref<16x32xf32, #tpu.memory_space<vmem>>, %arg2: memref<3x32x32xf32, #tpu.memory_space<vmem>>, %arg3: memref<3x1x32xf32, #tpu.memory_space<vmem>>, %arg4: memref<16x32xf32, #tpu.memory_space<vmem>>) attributes {dimension_semantics = [#tpu.dimension_semantics<parallel>], iteration_bounds = array<i64: 1>, scalar_prefetch = 0 : i64, scratch_operands = 0 : i64, tpu.core_type = #tpu.core_type<tc>, window_params = [{transform_indices = @transform_0, window_bounds = array<i64: 16, 32>}, {pipeline_mode = #tpu.pipeline_mode<synchronous>, transform_indices = @transform_1, window_bounds = array<i64: 3, 32, 32>}, {pipeline_mode = #tpu.pipeline_mode<synchronous>, transform_indices = @transform_2, window_bounds = array<i64: 3, 1, 32>}, {transform_indices = @transform_3, window_bounds = array<i64: 16, 32>}]} {
    %c0 = arith.constant 0 : index
    %c0_0 = arith.constant 0 : index
    %0 = vector.load %arg1[%c0, %c0_0] : memref<16x32xf32, #tpu.memory_space<vmem>>, vector<16x32xf32>
    %c0_1 = arith.constant 0 : index
    %c0_2 = arith.constant 0 : index
    %c0_3 = arith.constant 0 : index
    %1 = vector.load %arg3[%c0_1, %c0_2, %c0_3] : memref<3x1x32xf32, #tpu.memory_space<vmem>>, vector<1x1x32xf32>
    %2 = vector.shape_cast %1 : vector<1x1x32xf32> to vector<1x32xf32>
    %c1 = arith.constant 1 : index
    %c0_4 = arith.constant 0 : index
    %c0_5 = arith.constant 0 : index
    %3 = vector.load %arg3[%c1, %c0_4, %c0_5] : memref<3x1x32xf32, #tpu.memory_space<vmem>>, vector<1x1x32xf32>
    %4 = vector.shape_cast %3 : vector<1x1x32xf32> to vector<1x32xf32>
    %c2 = arith.constant 2 : index
    %c0_6 = arith.constant 0 : index
    %c0_7 = arith.constant 0 : index
    %5 = vector.load %arg3[%c2, %c0_6, %c0_7] : memref<3x1x32xf32, #tpu.memory_space<vmem>>, vector<1x1x32xf32>
    %6 = vector.shape_cast %5 : vector<1x1x32xf32> to vector<1x32xf32>
    %c0_8 = arith.constant 0 : index
    %c0_9 = arith.constant 0 : index
    %c0_10 = arith.constant 0 : index
    %7 = vector.load %arg2[%c0_8, %c0_9, %c0_10] : memref<3x32x32xf32, #tpu.memory_space<vmem>>, vector<1x32x32xf32>
    %8 = vector.shape_cast %7 : vector<1x32x32xf32> to vector<32x32xf32>
    %cst = arith.constant dense<0.000000e+00> : vector<16x32xf32>
    %9 = tpu.matmul %0, %8, %cst {dimension_numbers = #tpu.dot_dimension_numbers<[1], [0], [0], [1], [0, 0, 1, 1], [], []>} : vector<16x32xf32>, vector<32x32xf32>, vector<16x32xf32> -> vector<16x32xf32>
    %10 = vector.broadcast %2 : vector<1x32xf32> to vector<16x32xf32>
    %11 = arith.addf %9, %10 : vector<16x32xf32>
    %cst_11 = arith.constant 0.000000e+00 : f32
    %12 = vector.broadcast %cst_11 : f32 to vector<16x32xf32>
    %13 = arith.maximumf %11, %12 : vector<16x32xf32>
    %14 = arith.addf %0, %13 : vector<16x32xf32>
    %c0_12 = arith.constant 0 : index
    %c0_13 = arith.constant 0 : index
    %c0_14 = arith.constant 0 : index
    %15 = vector.load %arg2[%c0_12, %c0_13, %c0_14] : memref<3x32x32xf32, #tpu.memory_space<vmem>>, vector<1x32x32xf32>
    %16 = vector.shape_cast %15 : vector<1x32x32xf32> to vector<32x32xf32>
    %cst_15 = arith.constant dense<0.000000e+00> : vector<16x32xf32>
    %17 = tpu.matmul %14, %16, %cst_15 {dimension_numbers = #tpu.dot_dimension_numbers<[1], [0], [0], [1], [0, 0, 1, 1], [], []>} : vector<16x32xf32>, vector<32x32xf32>, vector<16x32xf32> -> vector<16x32xf32>
    %18 = vector.broadcast %2 : vector<1x32xf32> to vector<16x32xf32>
    %19 = arith.addf %17, %18 : vector<16x32xf32>
    %cst_16 = arith.constant 0.000000e+00 : f32
    %20 = vector.broadcast %cst_16 : f32 to vector<16x32xf32>
    %21 = arith.maximumf %19, %20 : vector<16x32xf32>
    %c1_17 = arith.constant 1 : index
    %c0_18 = arith.constant 0 : index
    %c0_19 = arith.constant 0 : index
    %22 = vector.load %arg2[%c1_17, %c0_18, %c0_19] : memref<3x32x32xf32, #tpu.memory_space<vmem>>, vector<1x32x32xf32>
    %23 = vector.shape_cast %22 : vector<1x32x32xf32> to vector<32x32xf32>
    %cst_20 = arith.constant dense<0.000000e+00> : vector<16x32xf32>
    %24 = tpu.matmul %21, %23, %cst_20 {dimension_numbers = #tpu.dot_dimension_numbers<[1], [0], [0], [1], [0, 0, 1, 1], [], []>} : vector<16x32xf32>, vector<32x32xf32>, vector<16x32xf32> -> vector<16x32xf32>
    %25 = vector.broadcast %4 : vector<1x32xf32> to vector<16x32xf32>
    %26 = arith.addf %24, %25 : vector<16x32xf32>
    %cst_21 = arith.constant 0.000000e+00 : f32
    %27 = vector.broadcast %cst_21 : f32 to vector<16x32xf32>
    %28 = arith.maximumf %26, %27 : vector<16x32xf32>
    %29 = arith.addf %0, %28 : vector<16x32xf32>
    %c0_22 = arith.constant 0 : index
    %c0_23 = arith.constant 0 : index
    %c0_24 = arith.constant 0 : index
    %30 = vector.load %arg2[%c0_22, %c0_23, %c0_24] : memref<3x32x32xf32, #tpu.memory_space<vmem>>, vector<1x32x32xf32>
    %31 = vector.shape_cast %30 : vector<1x32x32xf32> to vector<32x32xf32>
    %cst_25 = arith.constant dense<0.000000e+00> : vector<16x32xf32>
    %32 = tpu.matmul %29, %31, %cst_25 {dimension_numbers = #tpu.dot_dimension_numbers<[1], [0], [0], [1], [0, 0, 1, 1], [], []>} : vector<16x32xf32>, vector<32x32xf32>, vector<16x32xf32> -> vector<16x32xf32>
    %33 = vector.broadcast %2 : vector<1x32xf32> to vector<16x32xf32>
    %34 = arith.addf %32, %33 : vector<16x32xf32>
    %cst_26 = arith.constant 0.000000e+00 : f32
    %35 = vector.broadcast %cst_26 : f32 to vector<16x32xf32>
    %36 = arith.maximumf %34, %35 : vector<16x32xf32>
    %c1_27 = arith.constant 1 : index
    %c0_28 = arith.constant 0 : index
    %c0_29 = arith.constant 0 : index
    %37 = vector.load %arg2[%c1_27, %c0_28, %c0_29] : memref<3x32x32xf32, #tpu.memory_space<vmem>>, vector<1x32x32xf32>
    %38 = vector.shape_cast %37 : vector<1x32x32xf32> to vector<32x32xf32>
    %cst_30 = arith.constant dense<0.000000e+00> : vector<16x32xf32>
    %39 = tpu.matmul %36, %38, %cst_30 {dimension_numbers = #tpu.dot_dimension_numbers<[1], [0], [0], [1], [0, 0, 1, 1], [], []>} : vector<16x32xf32>, vector<32x32xf32>, vector<16x32xf32> -> vector<16x32xf32>
    %40 = vector.broadcast %4 : vector<1x32xf32> to vector<16x32xf32>
    %41 = arith.addf %39, %40 : vector<16x32xf32>
    %cst_31 = arith.constant 0.000000e+00 : f32
    %42 = vector.broadcast %cst_31 : f32 to vector<16x32xf32>
    %43 = arith.maximumf %41, %42 : vector<16x32xf32>
    %c2_32 = arith.constant 2 : index
    %c0_33 = arith.constant 0 : index
    %c0_34 = arith.constant 0 : index
    %44 = vector.load %arg2[%c2_32, %c0_33, %c0_34] : memref<3x32x32xf32, #tpu.memory_space<vmem>>, vector<1x32x32xf32>
    %45 = vector.shape_cast %44 : vector<1x32x32xf32> to vector<32x32xf32>
    %cst_35 = arith.constant dense<0.000000e+00> : vector<16x32xf32>
    %46 = tpu.matmul %43, %45, %cst_35 {dimension_numbers = #tpu.dot_dimension_numbers<[1], [0], [0], [1], [0, 0, 1, 1], [], []>} : vector<16x32xf32>, vector<32x32xf32>, vector<16x32xf32> -> vector<16x32xf32>
    %47 = vector.broadcast %6 : vector<1x32xf32> to vector<16x32xf32>
    %48 = arith.addf %46, %47 : vector<16x32xf32>
    %cst_36 = arith.constant 0.000000e+00 : f32
    %49 = vector.broadcast %cst_36 : f32 to vector<16x32xf32>
    %50 = arith.maximumf %48, %49 : vector<16x32xf32>
    %51 = arith.addf %0, %50 : vector<16x32xf32>
    %c0_37 = arith.constant 0 : index
    %c0_38 = arith.constant 0 : index
    %52 = vector.load %arg4[%c0_37, %c0_38] : memref<16x32xf32, #tpu.memory_space<vmem>>, vector<16x32xf32>
    tpu.vector_store %arg4[%c0_37, %c0_38], %51 {strides = array<i32>} : memref<16x32xf32, #tpu.memory_space<vmem>>, vector<16x32xf32>,
    return
  }
  func.func @transform_0(%arg0: i32) -> (i32, i32) {
    %c0_i32 = arith.constant 0 : i32
    %c0_i32_0 = arith.constant 0 : i32
    return %arg0, %c0_i32 : i32, i32
  }
  func.func @transform_1(%arg0: i32) -> (i32, i32, i32) {
    %c0_i32 = arith.constant 0 : i32
    %c0_i32_0 = arith.constant 0 : i32
    %c0_i32_1 = arith.constant 0 : i32
    %c0_i32_2 = arith.constant 0 : i32
    return %c0_i32, %c0_i32_0, %c0_i32_1 : i32, i32, i32
  }
  func.func @transform_2(%arg0: i32) -> (i32, i32, i32) {
    %c0_i32 = arith.constant 0 : i32
    %c0_i32_0 = arith.constant 0 : i32
    %c0_i32_1 = arith.constant 0 : i32
    %c0_i32_2 = arith.constant 0 : i32
    return %c0_i32, %c0_i32_0, %c0_i32_1 : i32, i32, i32
  }
  func.func @transform_3(%arg0: i32) -> (i32, i32) {
    %c0_i32 = arith.constant 0 : i32
    %c0_i32_0 = arith.constant 0 : i32
    return %arg0, %c0_i32 : i32, i32
  }
}

</mosaic_0001>

<bundles_post_ra>
// kernel: tpu_custom_call.1
= control target key start
LH: loop header
LB: loop body
LE: loop exit
PB: predicated region body
PF: predicated region fallthrough
CT: control target
= control target key end

     0   :  { %8 = vsyncpa [#allocation3], 0  ;;  %s956_s0 = inlined_call_operand.hbm [shape: f32[16,32], index: 0, kind: input, shape index: {}]   ;;  %s957_s1 = inlined_call_operand.hbm [shape: f32[3,32,32], index: 1, kind: input, shape index: {}]   ;;  %s958_s2 = inlined_call_operand.vmem [shape: f32[3,1,32], index: 2, kind: input, shape index: {}]   ;;  %s959_s3 = inlined_call_operand.hbm [shape: f32[16,32], index: 3, kind: output, shape index: {}]  }
   0x1   :  { %9 = vsyncpa [#allocation6], 0 }
   0x2   :  { %10 = vsyncpa [#allocation4], 0  ;;  %s851_s12 = smov [#allocation2]   ;;  %s779_s16 = scalar_lea.hbm %s956_s0, 256 }
   0x3   :  { %s16_s13 = sshll.u32 %s851_s12, 4  ;;  %p780_p0 = scmp.ne.s32.totalorder %s956_s0, %s779_s16  ;;  %s17_s13 = int_to_ptr.vmem [resolvable:$true] %s16_s13 }
   0x4   :  { %p783_p1 = scmp.lt.u32.totalorder %s779_s16, %s956_s0 }
   0x6   :  { %p785_p2 = pnand %p783_p1, %p780_p0 }
   0x8   :  { %788 = shalt.err (!%p785_p2)
}
   0x9   :  { %s789_s21 = scalar_lea.vmem %s17_s13, 256  ;;  %p794_p4 = scmp.lt.s32.totalorder %s17_s13, %s17_s13 }
   0xa   :  { %p790_p3 = scmp.ne.s32.totalorder %s17_s13, %s789_s21  ;;  %p795_p5 = scmp.lt.s32.totalorder %s789_s21, %s789_s21 }
   0xc   :  { %p796_p6 = por %p795_p5, %p794_p4 }
   0xe   :  { %p797_p7 = pnand %p796_p6, %p790_p3 }
  0x10   :  { %800 = shalt.err (!%p797_p7)
}
  0x11   :  { %s852_s22 = smov 128   ;;  %s853_s23 = smov 8  }
  0x12   :  { %22 = dma.hbm_to_vmem [thread:$0]  %s956_s0, 256, %s17_s13, [#allocation3], %s852_s22, %s852_s22, %s853_s23  }
  0x13   :  { %s854_s26 = smov [#allocation5]   ;;  %s801_s30 = scalar_lea.hbm %s957_s1, 1536 }
  0x14   :  { %s28_s27 = sshll.u32 %s854_s26, 4  ;;  %p802_p8 = scmp.ne.s32.totalorder %s957_s1, %s801_s30  ;;  %s29_s27 = int_to_ptr.vmem [resolvable:$true] %s28_s27 }
  0x15   :  { %p805_p9 = scmp.lt.u32.totalorder %s801_s30, %s957_s1 }
  0x17   :  { %p807_p10 = pnand %p805_p9, %p802_p8 }
  0x19   :  { %810 = shalt.err (!%p807_p10)
}
  0x1a   :  { %s811_s8 = scalar_lea.vmem %s29_s27, 1536  ;;  %p816_p12 = scmp.lt.s32.totalorder %s29_s27, %s29_s27 }
  0x1b   :  { %p812_p11 = scmp.ne.s32.totalorder %s29_s27, %s811_s8  ;;  %p817_p13 = scmp.lt.s32.totalorder %s811_s8, %s811_s8 }
  0x1d   :  { %p818_p0 = por %p817_p13, %p816_p12 }
  0x1f   :  { %p819_p1 = pnand %p818_p0, %p812_p11 }
  0x21   :  { %822 = shalt.err (!%p819_p1)
}
  0x22   :  { %34 = dma.hbm_to_vmem [thread:$0]  %s957_s1, 1536, %s29_s27, [#allocation6], %s852_s22, %s852_s22, %s853_s23  }
  0x23   :  { %845 = dma.done.wait [#allocation3], 256  }
  0x24   :  { %846 = vsyncadd [#allocation3], 4294967040 }
  0x25   :  { %847 = dma.done.wait [#allocation6], 1536  }
  0x26   :  { %848 = vsyncadd [#allocation6], 4294965760  ;;  %vm60_vm0 = vcmask 261120   ;;  %v50_v0 = vld [vmem:[#allocation5] sm:$0xff]  ;;  %v51_v1 = vld [vmem:[#allocation5 + $0x8] sm:$0xff]  ;;  %s855_s15 = smov [#allocation7]  }
  0x27   :  { %v52_v2 = vld [vmem:[#allocation5 + $0x10] sm:$0xff]  ;;  %v726_v3 = vpack.c.bf16 %v51_v1, %v50_v0  ;;  %v53_v4 = vld [vmem:[#allocation5 + $0x18] sm:$0xff]  ;;  %v230_v8 = vld [vmem:[#allocation5 + $0x20] sm:$0xff]  ;;  %s594_s16 = sshll.u32 %s855_s15, 4  ;;  %s595_s16 = int_to_ptr.vmem [resolvable:$true] %s594_s16 }
  0x28   :  { %v906_v5 = vld [vmem:[#allocation2] sm:$0xff]  ;;  %v730_v6 = vpack.c.bf16 %v53_v4, %v52_v2  ;;  %v910_v7 = vld [vmem:[#allocation2 + $0x8] sm:$0xff]  ;;  %v231_v9 = vld [vmem:[#allocation5 + $0x28] sm:$0xff]  ;;  %s823_s17 = scalar_lea.vmem %s595_s16, 256  ;;  %p828_p3 = scmp.lt.s32.totalorder %s595_s16, %s595_s16 }
  0x29   :  { %668 = vmatprep.mubr.msk.f32.mxu0 %vm60_vm0, %v906_v5  ;;  %727 = vmatprep.subr.bf16.mxu0 %v726_v3  ;;  %v742_v10 = vpack.c.bf16 %v231_v9, %v230_v8  ;;  %v609_v11 = vld [vmem:[%s958_s2] ss:$0 sm:$0xff]  ;;  %v233_v21 = vld [vmem:[#allocation5 + $0x38] sm:$0xff]  ;;  %v614_v29 = vld [vmem:[%s958_s2 + $0x1] ss:$0 sm:$0xff]  ;;  %p824_p2 = scmp.ne.s32.totalorder %s595_s16, %s823_s17  ;;  %p829_p4 = scmp.lt.s32.totalorder %s823_s17, %s823_s17 }
  0x2a   :  { %735 = vmatprep.subr.bf16.mxu1 %v726_v3  ;;  %729 = vmatpush3.bf16.msra.mxu0 %v726_v3  ;;  %v232_v20 = vld [vmem:[#allocation5 + $0x30] sm:$0xff]  ;;  %v492_v38 = vld [vmem:[#allocation5 + $0x40] sm:$0xff]  ;;  %v493_v39 = vld [vmem:[#allocation5 + $0x48] sm:$0xff] }
  0x2b   :  { %737 = vmatpush3.bf16.msra.mxu1 %v726_v3  ;;  %731 = vmatprep.subr.bf16.mxu0 %v730_v6  ;;  %v746_v22 = vpack.c.bf16 %v233_v21, %v232_v20  ;;  %v766_v40 = vpack.c.bf16 %v493_v39, %v492_v38  ;;  %v494_v47 = vld [vmem:[#allocation5 + $0x50] sm:$0xff]  ;;  %v495_v48 = vld [vmem:[#allocation5 + $0x58] sm:$0xff]  ;;  %p830_p5 = por %p829_p4, %p828_p3 }
  0x2c   :  { %739 = vmatprep.subr.bf16.mxu1 %v730_v6  ;;  %v770_v49 = vpack.c.bf16 %v495_v48, %v494_v47  ;;  %v621_v56 = vld [vmem:[%s958_s2 + $0x2] ss:$0 sm:$0xff] }
  0x2d   :  { %p831_p6 = pnand %p830_p5, %p824_p2 }
  0x2e   :  { %733 = vmatpush3.bf16.msra.mxu0 %v730_v6 }
  0x2f   :  { %741 = vmatpush3.bf16.msra.mxu1 %v730_v6  ;;  %743 = vmatprep.subr.bf16.mxu0 %v742_v10 }
  0x30   :  { %751 = vmatprep.subr.bf16.mxu1 %v726_v3 }
  0x31   :  { %669 = vmatmul.mubr.msk.f32.vlgmr.msra.gmra.mrb[0].mxu0 %vm60_vm0, %v910_v7 }
  0x32   :  { %745 = vmatpush3.bf16.msra.mxu0 %v742_v10 }
  0x33   :  { %747 = vmatprep.subr.bf16.mxu0 %v746_v22 }
  0x36   :  { %749 = vmatpush3.bf16.msra.mxu0 %v746_v22 }
  0x37   :  { %759 = vmatprep.subr.bf16.mxu0 %v742_v10 }
 0x104   :  { %v670_v12 = vpop.f32.mrb[0].mxu0 }
 0x105   :  { %v139_v13 = vadd.f32 %v670_v12, %v609_v11  ;;  %v133_v14 = vpop.f32.mrb[1].mxu0 }
 0x106   :  { %v134_v15 = vadd.f32 %v609_v11, %v133_v14 }
 0x107   :  { %v143_v16 = vmax.f32 %v139_v13, 0.0 }
 0x108   :  { %v142_v17 = vmax.f32 %v134_v15, 0.0 }
 0x109   :  { %v145_v19 = vadd.f32 %v143_v16, %v910_v7 }
 0x10a   :  { %v144_v18 = vadd.f32 %v142_v17, %v906_v5 }
 0x10c   :  { %679 = vmatprep.mubr.msk.f32.mxu1 %vm60_vm0, %v144_v18 }
 0x10d   :  { %680 = vmatmul.mubr.msk.f32.vlgmr.msra.gmra.mrb[0].mxu1 %vm60_vm0, %v145_v19 }
 0x10e   :  { %753 = vmatpush3.bf16.msra.mxu1 %v726_v3 }
 0x10f   :  { %755 = vmatprep.subr.bf16.mxu1 %v730_v6 }
 0x112   :  { %757 = vmatpush3.bf16.msra.mxu1 %v730_v6 }
 0x113   :  { %767 = vmatprep.subr.bf16.mxu1 %v766_v40 }
 0x1e0   :  { %v681_v23 = vpop.f32.mrb[0].mxu1 }
 0x1e1   :  { %v224_v24 = vadd.f32 %v681_v23, %v609_v11  ;;  %v218_v25 = vpop.f32.mrb[1].mxu1 }
 0x1e2   :  { %v219_v26 = vadd.f32 %v609_v11, %v218_v25 }
 0x1e3   :  { %v228_v28 = vmax.f32 %v224_v24, 0.0 }
 0x1e4   :  { %v227_v27 = vmax.f32 %v219_v26, 0.0 }
 0x1e6   :  { %690 = vmatprep.mubr.msk.f32.mxu0 %vm60_vm0, %v227_v27 }
 0x1e7   :  { %691 = vmatmul.mubr.msk.f32.vlgmr.msra.gmra.mrb[2].mxu0 %vm60_vm0, %v228_v28 }
 0x1e8   :  { %761 = vmatpush3.bf16.msra.mxu0 %v742_v10 }
 0x1e9   :  { %763 = vmatprep.subr.bf16.mxu0 %v746_v22 }
 0x1ec   :  { %765 = vmatpush3.bf16.msra.mxu0 %v746_v22 }
 0x2ba   :  { %v692_v30 = vpop.f32.mrb[2].mxu0 }
 0x2bb   :  { %v318_v31 = vadd.f32 %v692_v30, %v614_v29  ;;  %v312_v32 = vpop.f32.mrb[3].mxu0 }
 0x2bc   :  { %v313_v33 = vadd.f32 %v614_v29, %v312_v32 }
 0x2bd   :  { %v322_v34 = vmax.f32 %v318_v31, 0.0 }
 0x2be   :  { %v321_v35 = vmax.f32 %v313_v33, 0.0 }
 0x2bf   :  { %v324_v37 = vadd.f32 %v322_v34, %v910_v7 }
 0x2c0   :  { %v323_v36 = vadd.f32 %v321_v35, %v906_v5 }
 0x2c2   :  { %701 = vmatprep.mubr.msk.f32.mxu1 %vm60_vm0, %v323_v36 }
 0x2c3   :  { %702 = vmatmul.mubr.msk.f32.vlgmr.msra.gmra.mrb[2].mxu1 %vm60_vm0, %v324_v37 }
 0x2c4   :  { %769 = vmatpush3.bf16.msra.mxu1 %v766_v40 }
 0x2c5   :  { %771 = vmatprep.subr.bf16.mxu1 %v770_v49 }
 0x2c8   :  { %773 = vmatpush3.bf16.msra.mxu1 %v770_v49 }
 0x396   :  { %v703_v41 = vpop.f32.mrb[2].mxu1 }
 0x397   :  { %v403_v42 = vadd.f32 %v703_v41, %v609_v11  ;;  %v397_v43 = vpop.f32.mrb[3].mxu1 }
 0x398   :  { %v398_v44 = vadd.f32 %v609_v11, %v397_v43 }
 0x399   :  { %v407_v46 = vmax.f32 %v403_v42, 0.0 }
 0x39a   :  { %v406_v45 = vmax.f32 %v398_v44, 0.0 }
 0x39c   :  { %712 = vmatprep.mubr.msk.f32.mxu0 %vm60_vm0, %v406_v45 }
 0x39d   :  { %713 = vmatmul.mubr.msk.f32.vlgmr.msra.gmra.mrb[4].mxu0 %vm60_vm0, %v407_v46 }
 0x470   :  { %v714_v50 = vpop.f32.mrb[4].mxu0 }
 0x471   :  { %v486_v51 = vadd.f32 %v714_v50, %v614_v29  ;;  %v480_v52 = vpop.f32.mrb[5].mxu0 }
 0x472   :  { %v481_v53 = vadd.f32 %v614_v29, %v480_v52 }
 0x473   :  { %v490_v55 = vmax.f32 %v486_v51, 0.0 }
 0x474   :  { %v489_v54 = vmax.f32 %v481_v53, 0.0 }
 0x476   :  { %723 = vmatprep.mubr.msk.f32.mxu1 %vm60_vm0, %v489_v54 }
 0x477   :  { %724 = vmatmul.mubr.msk.f32.vlgmr.msra.gmra.mrb[4].mxu1 %vm60_vm0, %v490_v55 }
 0x54a   :  { %v725_v57 = vpop.f32.mrb[4].mxu1 }
 0x54b   :  { %v580_v58 = vadd.f32 %v725_v57, %v621_v56  ;;  %v574_v59 = vpop.f32.mrb[5].mxu1 }
 0x54c   :  { %v575_v60 = vadd.f32 %v621_v56, %v574_v59 }
 0x54d   :  { %v584_v61 = vmax.f32 %v580_v58, 0.0 }
 0x54e   :  { %v583_v62 = vmax.f32 %v575_v60, 0.0 }
 0x54f   :  { %v586_v63 = vadd.f32 %v584_v61, %v910_v7 }
 0x550   :  { %v585_v0 = vadd.f32 %v583_v62, %v906_v5 }
 0x551   :  { %588 = vst.msk [vmem:[#allocation7 + $0x8] sm:$0xff] %vm60_vm0, %v586_v63 }
 0x552   :  { %587 = vst.msk [vmem:[#allocation7] sm:$0xff] %vm60_vm0, %v585_v0 }
 0x553   :  { %834 = shalt.err (!%p831_p6)
}
 0x554   :  { %s835_s19 = scalar_lea.hbm %s959_s3, 256 }
 0x555   :  { %p836_p7 = scmp.ne.s32.totalorder %s959_s3, %s835_s19  ;;  %p839_p8 = scmp.lt.u32.totalorder %s835_s19, %s959_s3 }
 0x557   :  { %p841_p9 = pnand %p839_p8, %p836_p7 }
 0x559   :  { %844 = shalt.err (!%p841_p9)
}
 0x55a   :  { %600 = dma.vmem_to_hbm [thread:$0]  %s595_s16, 256, %s959_s3, [#allocation4], %s852_s22, %s852_s22, %s853_s23  }
 0x55b   :  { %849 = dma.done.wait [#allocation4], 256  }
 0x55c   :  { %850 = vsyncadd [#allocation4], 4294967040 }
 0x55d   :  { %604 = vsyncpa [#allocation3], 1 }
 0x55e   :  { %605 = vsyncpa [#allocation6], 1 }
 0x55f   :  { %606 = vsyncpa [#allocation4], 1 }

</bundles_post_ra>
